<compile_context>
chip_gen: v5e
topology: v5e:2x2
jax: 0.10.0
libtpu: 0.0.40
codegen_flags: <defaults>
</compile_context>

<pallas_src>
import functools

import jax
import jax.numpy as jnp
from jax.experimental import pallas as pl
from jax.experimental.pallas import tpu as pltpu

_LANES = 128
_MAX_BLOCK_ROWS = 512  # 512*128*4B = 256 KiB per buffer -> fits every TPU gen easily


def _awgn_apply_kernel(scale_ref, x_ref, noise_ref, out_ref, *, sqrt_power):
    """out = sqrt_power * x + noise * noise_scale  (noise_scale = sigma*sqrt(2*avg_pwr))."""
    x = x_ref[...].astype(jnp.float32)
    if sqrt_power != 1.0:          # static specialization; power==1 is the default
        x = sqrt_power * x
    noise_scale = scale_ref[0]     # f32 scalar in SMEM (scalar prefetch)
    out_ref[...] = (x + noise_ref[...].astype(jnp.float32) * noise_scale).astype(
        out_ref.dtype
    )


def channel_forward(x, seed, *, chan_type="awgn", chan_param=10.0, power=1.0):
    """Pallas equivalent of Channel.forward(input) with avg_pwr=None.

    Returns (channel_rx, channel_usage).
    """
    orig_shape = x.shape
    orig_dtype = x.dtype
    n = x.size
    assert n % 2 == 0, "complex packing needs an even number of elements"
    channel_usage = n // 2
    sqrt_power = float(power) ** 0.5

    # Noiseless: (sqrt(power)*x/s)*s == sqrt(power)*x exactly -> no kernel needed.
    if chan_type in (0, "noiseless"):
        if sqrt_power == 1.0:
            return x, channel_usage
        return (sqrt_power * x.astype(jnp.float32)).astype(orig_dtype), channel_usage

    # ---- AWGN path ----
    sigma = float((1.0 / (2.0 * 10.0 ** (chan_param / 10.0))) ** 0.5)

    xf = x.reshape(-1).astype(jnp.float32)
    avg_pwr = jnp.mean(xf * xf)                                  # global reduction
    noise_scale = jnp.reshape(sigma * jnp.sqrt(2.0 * avg_pwr), (1,)).astype(jnp.float32)

    # iid N(0,1) per flattened element (real parts -> even idx, imag -> odd idx
    # in the reference; element-wise this is simply independent noise everywhere).
    noise = jax.random.normal(jax.random.PRNGKey(seed), (n,), dtype=jnp.float32)

    # Lane-dense 2-D slab, padded so rows are a multiple of the block size.
    rows = -(-n // _LANES)
    if rows >= _MAX_BLOCK_ROWS:
        block_rows = _MAX_BLOCK_ROWS
    else:
        block_rows = ((rows + 7) // 8) * 8
    rows_padded = ((rows + block_rows - 1) // block_rows) * block_rows
    pad = rows_padded * _LANES - n
    if pad:
        xf = jnp.pad(xf, (0, pad))
        noise = jnp.pad(noise, (0, pad))
    x2d = xf.reshape(rows_padded, _LANES)
    n2d = noise.reshape(rows_padded, _LANES)

    kernel = functools.partial(_awgn_apply_kernel, sqrt_power=sqrt_power)

    out2d = pl.pallas_call(
        kernel,
        out_shape=jax.ShapeDtypeStruct((rows_padded, _LANES), jnp.float32),
        grid_spec=pltpu.PrefetchScalarGridSpec(
            num_scalar_prefetch=1,                 # noise_scale -> SMEM scalar
            grid=(rows_padded // block_rows,),
            in_specs=[
                pl.BlockSpec((block_rows, _LANES), lambda i, s: (i, 0)),
                pl.BlockSpec((block_rows, _LANES), lambda i, s: (i, 0)),
            ],
            out_specs=pl.BlockSpec((block_rows, _LANES), lambda i, s: (i, 0)),
        ),
        compiler_params=pltpu.CompilerParams(
            dimension_semantics=("parallel",),      # megacore sharding on v7x
        ),
    )(noise_scale, x2d, n2d)

    out = out2d.reshape(-1)[:n].reshape(orig_shape).astype(orig_dtype)
    return out, channel_usage


if __name__ == "__main__":
    key = jax.random.PRNGKey(0)
    # Small NCHW input consistent with the image-codec usage of this module.
    x = jax.random.normal(key, (2, 4, 16, 16), dtype=jnp.float32)

    # AWGN channel, SNR = 10 dB (config.channel = {'type': 'awgn', 'chan_param': 10})
    rx, usage = channel_forward(x, seed=1234, chan_type="awgn", chan_param=10.0, power=1.0)
    rx = jax.block_until_ready(rx)

    assert rx.shape == x.shape and rx.dtype == x.dtype
    assert usage == x.size // 2

    # Noiseless path must be sqrt(power)*x exactly (scale cancels).
    rx_nl, _ = channel_forward(x, seed=0, chan_type="noiseless", chan_param=10.0)
    rx_nl = jax.block_until_ready(rx_nl)
    assert jnp.allclose(rx_nl, x, rtol=1e-5, atol=1e-5)

    # AWGN residual std should be ~ sigma * sqrt(2*avg_pwr)
    # (not bit-exact vs torch — different PRNG — but same distribution).
    avg_pwr = float(jnp.mean(x * x))
    sigma = (1.0 / (2.0 * 10.0 ** (10.0 / 10.0))) ** 0.5
    resid_std = float(jnp.std(rx - x))
    expected_std = sigma * (2.0 * avg_pwr) ** 0.5
    assert abs(resid_std - expected_std) / expected_std < 0.25

    print("KERNEL_OK")
</pallas_src>

<mosaic_0001>
module attributes {stable_mosaic.version = 11 : i64} {
  func.func @_awgn_apply_kernel(%arg0: i32, %arg1: memref<1xf32, #tpu.memory_space<smem>>, %arg2: memref<16x128xf32, #tpu.memory_space<vmem>>, %arg3: memref<16x128xf32, #tpu.memory_space<vmem>>, %arg4: memref<16x128xf32, #tpu.memory_space<vmem>>) attributes {dimension_semantics = [#tpu.dimension_semantics<parallel>], iteration_bounds = array<i64: 1>, scalar_prefetch = 1 : i64, scratch_operands = 0 : i64, tpu.core_type = #tpu.core_type<tc>, window_params = [{transform_indices = @transform_0, window_bounds = array<i64: 16, 128>}, {transform_indices = @transform_1, window_bounds = array<i64: 16, 128>}, {transform_indices = @transform_2, window_bounds = array<i64: 16, 128>}]} {
    %c0 = arith.constant 0 : index
    %c0_0 = arith.constant 0 : index
    %0 = vector.load %arg2[%c0, %c0_0] : memref<16x128xf32, #tpu.memory_space<vmem>>, vector<16x128xf32>
    %c0_1 = arith.constant 0 : index
    %1 = memref.load %arg1[%c0_1] : memref<1xf32, #tpu.memory_space<smem>>
    %c0_2 = arith.constant 0 : index
    %c0_3 = arith.constant 0 : index
    %2 = vector.load %arg3[%c0_2, %c0_3] : memref<16x128xf32, #tpu.memory_space<vmem>>, vector<16x128xf32>
    %3 = vector.broadcast %1 : f32 to vector<16x128xf32>
    %4 = arith.mulf %2, %3 : vector<16x128xf32>
    %5 = arith.addf %0, %4 : vector<16x128xf32>
    %c0_4 = arith.constant 0 : index
    %c0_5 = arith.constant 0 : index
    %6 = vector.load %arg4[%c0_4, %c0_5] : memref<16x128xf32, #tpu.memory_space<vmem>>, vector<16x128xf32>
    tpu.vector_store %arg4[%c0_4, %c0_5], %5 {strides = array<i32>} : memref<16x128xf32, #tpu.memory_space<vmem>>, vector<16x128xf32>,
    return
  }
  func.func @transform_0(%arg0: i32, %arg1: memref<1xf32, #tpu.memory_space<smem>>) -> (i32, i32) {
    %c0_i32 = arith.constant 0 : i32
    %c0_i32_0 = arith.constant 0 : i32
    return %arg0, %c0_i32 : i32, i32
  }
  func.func @transform_1(%arg0: i32, %arg1: memref<1xf32, #tpu.memory_space<smem>>) -> (i32, i32) {
    %c0_i32 = arith.constant 0 : i32
    %c0_i32_0 = arith.constant 0 : i32
    return %arg0, %c0_i32 : i32, i32
  }
  func.func @transform_2(%arg0: i32, %arg1: memref<1xf32, #tpu.memory_space<smem>>) -> (i32, i32) {
    %c0_i32 = arith.constant 0 : i32
    %c0_i32_0 = arith.constant 0 : i32
    return %arg0, %c0_i32 : i32, i32
  }
}

</mosaic_0001>

<bundles_post_ra>
// kernel: tpu_custom_call.1
= control target key start
LH: loop header
LB: loop body
LE: loop exit
PB: predicated region body
PF: predicated region fallthrough
CT: control target
= control target key end

     0   :  { %9 = vsyncpa [#allocation5], 0  ;;  %s207_s0 = inlined_call_operand.<no memory space> [shape: f32[1], index: 0, kind: input, shape index: {}]   ;;  %s208_s1 = inlined_call_operand.hbm [shape: f32[16,128], index: 1, kind: input, shape index: {}]   ;;  %s209_s2 = inlined_call_operand.hbm [shape: f32[16,128], index: 2, kind: input, shape index: {}]   ;;  %s210_s3 = inlined_call_operand.hbm [shape: f32[16,128], index: 3, kind: output, shape index: {}]  }
   0x1   :  { %10 = vsyncpa [#allocation8], 0 }
   0x2   :  { %11 = vsyncpa [#allocation6], 0  ;;  %s16_s14 = sshll.u32 %s208_s1, 4  ;;  %s161_s15 = smov [#allocation4]   ;;  %s17_s14 = int_to_ptr.hbm [resolvable:$true] %s16_s14 }
   0x3   :  { %s18_s16 = sshll.u32 %s161_s15, 4  ;;  %s29_s19 = sshll.u32 %s209_s2, 4  ;;  %s19_s16 = int_to_ptr.vmem [resolvable:$true] %s18_s16  ;;  %s30_s19 = int_to_ptr.hbm [resolvable:$true] %s29_s19 }
   0x4   :  { %s162_s20 = smov 128   ;;  %s163_s21 = smov 8  }
   0x5   :  { %24 = dma.hbm_to_vmem [thread:$0]  %s17_s14, 256, %s19_s16, [#allocation5], %s162_s20, %s162_s20, %s163_s21  }
   0x6   :  { %s164_s22 = smov [#allocation7]  }
   0x7   :  { %s31_s23 = sshll.u32 %s164_s22, 4  ;;  %s32_s23 = int_to_ptr.vmem [resolvable:$true] %s31_s23 }
   0x8   :  { %37 = dma.hbm_to_vmem [thread:$0]  %s30_s19, 256, %s32_s23, [#allocation8], %s162_s20, %s162_s20, %s163_s21  }
   0x9   :  { %155 = dma.done.wait [#allocation5], 256  }
   0xa   :  { %156 = vsyncadd [#allocation5], 4294967040 }
   0xb   :  { %157 = dma.done.wait [#allocation8], 256  }
   0xc   :  { %158 = vsyncadd [#allocation8], 4294967040  ;;  %v51_v0 = vstv %s207_s0  ;;  %v46_v1 = vld [vmem:[#allocation4] sm:$0xff]  ;;  %v49_v2 = vld [vmem:[#allocation7] sm:$0xff]  ;;  %s165_s24 = smov [#allocation9]   ;;  %s64_s28 = sshll.u32 %s210_s3, 4  ;;  %s65_s28 = int_to_ptr.hbm [resolvable:$true] %s64_s28 }
   0xd   :  { %v52_v3 = vmul.f32 %v51_v0, %v49_v2  ;;  %v47_v4 = vld [vmem:[#allocation4 + $0x8] sm:$0xff]  ;;  %v50_v5 = vld [vmem:[#allocation7 + $0x8] sm:$0xff]  ;;  %s62_s25 = sshll.u32 %s165_s24, 4  ;;  %s63_s25 = int_to_ptr.vmem [resolvable:$true] %s62_s25 }
   0xe   :  { %v53_v6 = vmul.f32 %v51_v0, %v50_v5 }
   0xf   :  { %v54_v7 = vadd.f32 %v52_v3, %v46_v1 }
  0x10   :  { %v55_v8 = vadd.f32 %v53_v6, %v47_v4 }
  0x11   :  { %56 = vst [vmem:[#allocation9] sm:$0xff] %v54_v7 }
  0x12   :  { %57 = vst [vmem:[#allocation9 + $0x8] sm:$0xff] %v55_v8 }
  0x13   :  { %70 = dma.vmem_to_hbm [thread:$0]  %s63_s25, 256, %s65_s28, [#allocation6], %s162_s20, %s162_s20, %s163_s21  }
  0x14   :  { %159 = dma.done.wait [#allocation6], 256  }
  0x15   :  { %160 = vsyncadd [#allocation6], 4294967040 }
  0x16   :  { %75 = vsyncpa [#allocation5], 1 }
  0x17   :  { %76 = vsyncpa [#allocation8], 1 }
  0x18   :  { %77 = vsyncpa [#allocation6], 1 }

</bundles_post_ra>
